<compile_context>
chip_gen: v5e
topology: v5e:2x2
jax: 0.10.0
libtpu: 0.0.40
codegen_flags: <defaults>
</compile_context>

<pallas_src>
import math

import jax
import jax.numpy as jnp
from jax.experimental import pallas as pl
from jax.experimental.pallas import tpu as pltpu


# ----------------------------- kernels ---------------------------------------

def _pe_add_kernel(x_ref, pe_ref, o_ref):
    # x_ref: (tS, B, D), pe_ref: (tS, 1, D) -> broadcast over the batch axis.
    # Compute in f32 (no-op for f32 inputs; avoids per-op casts for bf16 on v5e).
    y = x_ref[...].astype(jnp.float32) + pe_ref[...].astype(jnp.float32)
    o_ref[...] = y.astype(o_ref.dtype)


def _pe_add_mask_kernel(x_ref, pe_ref, m_ref, o_ref):
    # m_ref holds pre-scaled dropout multipliers in {0, 1/(1-p)}.
    y = x_ref[...].astype(jnp.float32) + pe_ref[...].astype(jnp.float32)
    o_ref[...] = (y * m_ref[...].astype(jnp.float32)).astype(o_ref.dtype)


# ----------------------------- helpers ----------------------------------------

def make_positional_encoding_params(d_model: int, max_len: int = 5000,
                                    dtype=jnp.float32):
    """Deterministic construction of the `pe` parameter (same math as torch)."""
    position = jnp.arange(max_len, dtype=jnp.float32)[:, None]           # (L, 1)
    div_term = jnp.exp(jnp.arange(0, d_model, 2, dtype=jnp.float32)
                       * (-math.log(10000.0) / d_model))                 # (D/2,)
    pe = jnp.zeros((max_len, 1, d_model), dtype=jnp.float32)
    pe = pe.at[:, 0, 0::2].set(jnp.sin(position * div_term))
    pe = pe.at[:, 0, 1::2].set(jnp.cos(position * div_term))
    return pe.astype(dtype)


def _seq_tile_rows(S, B, D, itemsize, target_bytes=2 * 1024 * 1024):
    """Rows per tile so each array tile is ~target_bytes (VMEM-safe on v7x)."""
    rows = max(1, target_bytes // max(1, B * D * itemsize))
    if rows >= S:
        return S
    return max(8, (rows // 8) * 8)   # keep leading block dim 8-aligned


# ----------------------------- wrapper ----------------------------------------

def positional_encoding_forward(x, pe, *, dropout_p: float = 0.1,
                                training: bool = False, rng_key=None):
    """x: [seq_len, batch, d_model]; pe: [max_len, 1, d_model]."""
    S, B, D = x.shape
    pe_slice = pe[:S]                                  # (S, 1, D), same as torch

    tS = _seq_tile_rows(S, B, D, jnp.dtype(x.dtype).itemsize)
    grid = (pl.cdiv(S, tS),)

    x_spec = pl.BlockSpec((tS, B, D), lambda i: (i, 0, 0))
    pe_spec = pl.BlockSpec((tS, 1, D), lambda i: (i, 0, 0))
    out_spec = pl.BlockSpec((tS, B, D), lambda i: (i, 0, 0))

    cparams = pltpu.CompilerParams(
        dimension_semantics=("parallel",),             # megacore on v7x
        vmem_limit_bytes=32 * 1024 * 1024,
    )
    out_shape = jax.ShapeDtypeStruct((S, B, D), x.dtype)

    if (not training) or dropout_p == 0.0:
        return pl.pallas_call(
            _pe_add_kernel,
            grid=grid,
            in_specs=[x_spec, pe_spec],
            out_specs=out_spec,
            out_shape=out_shape,
            compiler_params=cparams,
        )(x, pe_slice)

    # Training mode: Bernoulli(1-p) keep mask, pre-scaled by 1/(1-p).
    # (RNG stream intentionally differs from torch's generator.)
    if rng_key is None:
        rng_key = jax.random.PRNGKey(0)
    keep = jax.random.bernoulli(rng_key, p=1.0 - dropout_p, shape=(S, B, D))
    scale = jnp.asarray(1.0 / (1.0 - dropout_p), dtype=x.dtype)
    mask = keep.astype(x.dtype) * scale

    return pl.pallas_call(
        _pe_add_mask_kernel,
        grid=grid,
        in_specs=[x_spec, pe_spec, x_spec],            # mask tiled like x
        out_specs=out_spec,
        out_shape=out_shape,
        compiler_params=cparams,
    )(x, pe_slice, mask)


# ----------------------------- main -------------------------------------------

if __name__ == "__main__":
    seq_len, batch, d_model = 8, 2, 32
    max_len = 64   # small max_len for the synthetic test (module default: 5000)

    key = jax.random.PRNGKey(0)
    kx, kdrop = jax.random.split(key)
    x = jax.random.normal(kx, (seq_len, batch, d_model), dtype=jnp.float32)

    pe = make_positional_encoding_params(d_model, max_len=max_len)

    # Eval-mode forward (dropout == identity) -> deterministic reference check.
    out = positional_encoding_forward(x, pe, dropout_p=0.1, training=False)
    out = jax.block_until_ready(out)
    ref = x + pe[:seq_len]
    assert out.shape == (seq_len, batch, d_model)
    assert jnp.allclose(out, ref, atol=1e-6, rtol=1e-6)

    # Training path: fused (x + pe) * dropout_mask inside the kernel.
    out_train = positional_encoding_forward(x, pe, dropout_p=0.1,
                                            training=True, rng_key=kdrop)
    out_train = jax.block_until_ready(out_train)
    assert out_train.shape == (seq_len, batch, d_model)
    # Kept elements must equal scaled (x + pe); dropped elements must be 0.
    scaled_ref = ref / (1.0 - 0.1)
    match_kept = jnp.isclose(out_train, scaled_ref, atol=1e-5, rtol=1e-5)
    is_zero = out_train == 0.0
    assert bool(jnp.all(match_kept | is_zero))

    print("KERNEL_OK")
</pallas_src>

<mosaic_0001>
module attributes {stable_mosaic.version = 11 : i64} {
  func.func @_pe_add_kernel(%arg0: i32, %arg1: memref<8x2x32xf32, #tpu.memory_space<vmem>>, %arg2: memref<8x1x32xf32, #tpu.memory_space<vmem>>, %arg3: memref<8x2x32xf32, #tpu.memory_space<vmem>>) attributes {dimension_semantics = [#tpu.dimension_semantics<parallel>], iteration_bounds = array<i64: 1>, scalar_prefetch = 0 : i64, scratch_operands = 0 : i64, tpu.core_type = #tpu.core_type<tc>, window_params = [{transform_indices = @transform_0, window_bounds = array<i64: 8, 2, 32>}, {transform_indices = @transform_1, window_bounds = array<i64: 8, 1, 32>}, {transform_indices = @transform_2, window_bounds = array<i64: 8, 2, 32>}]} {
    %c0 = arith.constant 0 : index
    %c0_0 = arith.constant 0 : index
    %c0_1 = arith.constant 0 : index
    %0 = vector.load %arg1[%c0, %c0_0, %c0_1] : memref<8x2x32xf32, #tpu.memory_space<vmem>>, vector<8x2x32xf32>
    %c0_2 = arith.constant 0 : index
    %c0_3 = arith.constant 0 : index
    %c0_4 = arith.constant 0 : index
    %1 = vector.load %arg2[%c0_2, %c0_3, %c0_4] : memref<8x1x32xf32, #tpu.memory_space<vmem>>, vector<8x1x32xf32>
    %2 = vector.broadcast %1 : vector<8x1x32xf32> to vector<8x2x32xf32>
    %3 = arith.addf %0, %2 : vector<8x2x32xf32>
    %c0_5 = arith.constant 0 : index
    %c0_6 = arith.constant 0 : index
    %c0_7 = arith.constant 0 : index
    %4 = vector.load %arg3[%c0_5, %c0_6, %c0_7] : memref<8x2x32xf32, #tpu.memory_space<vmem>>, vector<8x2x32xf32>
    tpu.vector_store %arg3[%c0_5, %c0_6, %c0_7], %3 {strides = array<i32>} : memref<8x2x32xf32, #tpu.memory_space<vmem>>, vector<8x2x32xf32>,
    return
  }
  func.func @transform_0(%arg0: i32) -> (i32, i32, i32) {
    %c0_i32 = arith.constant 0 : i32
    %c0_i32_0 = arith.constant 0 : i32
    %c0_i32_1 = arith.constant 0 : i32
    return %arg0, %c0_i32, %c0_i32_0 : i32, i32, i32
  }
  func.func @transform_1(%arg0: i32) -> (i32, i32, i32) {
    %c0_i32 = arith.constant 0 : i32
    %c0_i32_0 = arith.constant 0 : i32
    %c0_i32_1 = arith.constant 0 : i32
    return %arg0, %c0_i32, %c0_i32_0 : i32, i32, i32
  }
  func.func @transform_2(%arg0: i32) -> (i32, i32, i32) {
    %c0_i32 = arith.constant 0 : i32
    %c0_i32_0 = arith.constant 0 : i32
    %c0_i32_1 = arith.constant 0 : i32
    return %arg0, %c0_i32, %c0_i32_0 : i32, i32, i32
  }
}

</mosaic_0001>

<bundles_post_ra>
// kernel: tpu_custom_call.1
= control target key start
LH: loop header
LB: loop body
LE: loop exit
PB: predicated region body
PF: predicated region fallthrough
CT: control target
= control target key end

     0   :  { %7 = vsyncpa [#allocation3], 0  ;;  %s266_s0 = inlined_call_operand.hbm [shape: f32[8,2,32], index: 0, kind: input, shape index: {}]   ;;  %s267_s1 = inlined_call_operand.hbm [shape: f32[8,1,32], index: 1, kind: input, shape index: {}]   ;;  %s268_s2 = inlined_call_operand.hbm [shape: f32[8,2,32], index: 2, kind: output, shape index: {}]  }
   0x1   :  { %8 = vsyncpa [#allocation6], 0 }
   0x2   :  { %9 = vsyncpa [#allocation4], 0  ;;  %s14_s11 = sshll.u32 %s266_s0, 4  ;;  %s214_s12 = smov [#allocation2]   ;;  %s15_s11 = int_to_ptr.hbm [resolvable:$true] %s14_s11 }
   0x3   :  { %s16_s13 = sshll.u32 %s214_s12, 4  ;;  %s27_s16 = sshll.u32 %s267_s1, 4  ;;  %s17_s13 = int_to_ptr.vmem [resolvable:$true] %s16_s13  ;;  %s28_s16 = int_to_ptr.hbm [resolvable:$true] %s27_s16 }
   0x4   :  { %s215_s17 = smov 32   ;;  %s216_s18 = smov 2  }
   0x5   :  { %22 = dma.hbm_to_vmem [thread:$0]  %s15_s11, 256, %s17_s13, [#allocation3], %s215_s17, %s215_s17, %s216_s18  }
   0x6   :  { %s217_s19 = smov [#allocation5]   ;;  %s218_s21 = smov 16  }
   0x7   :  { %s29_s20 = sshll.u32 %s217_s19, 4  ;;  %s219_s0 = smov 1   ;;  %s30_s20 = int_to_ptr.vmem [resolvable:$true] %s29_s20 }
   0x8   :  { %35 = dma.hbm_to_vmem [thread:$0]  %s28_s16, 128, %s30_s20, [#allocation6], %s218_s21, %s218_s21, %s219_s0  }
   0x9   :  { %208 = dma.done.wait [#allocation3], 256  }
   0xa   :  { %209 = vsyncadd [#allocation3], 4294967040 }
   0xb   :  { %210 = dma.done.wait [#allocation6], 128  }
   0xc   :  { %211 = vsyncadd [#allocation6], 4294967168  ;;  %vm92_vm0 = vcmask 254976   ;;  %s220_s22 = smov [#allocation7]   ;;  %s107_s25 = sshll.u32 %s268_s2, 4  ;;  %s108_s25 = int_to_ptr.hbm [resolvable:$true] %s107_s25 }
   0xd   :  { %s245_s1 = sshll.u32 %s220_s22, 4  ;;  %v44_v0 = vld [vmem:[#allocation2] sm:$0x3]  ;;  %v128_v1 = vld [vmem:[#allocation5] ss:$0 sm:$0xff]  ;;  %s106_s1 = int_to_ptr.vmem [resolvable:$true] %s245_s1 }
   0xe   :  { %v45_v2 = vld [vmem:[#allocation2 + $0x2] sm:$0x3]  ;;  %v129_v3 = vld [vmem:[#allocation5 + $0x1] ss:$0 sm:$0xff]  ;;  %v84_v4 = vadd.f32 %v128_v1, %v44_v0  ;;  %v46_v5 = vld [vmem:[#allocation2 + $0x4] sm:$0x3] }
   0xf   :  { %v130_v6 = vld [vmem:[#allocation5 + $0x2] ss:$0 sm:$0xff]  ;;  %v85_v7 = vadd.f32 %v129_v3, %v45_v2  ;;  %v47_v8 = vld [vmem:[#allocation2 + $0x6] sm:$0x3]  ;;  %v131_v9 = vld [vmem:[#allocation5 + $0x3] ss:$0 sm:$0xff] }
  0x10   :  { %93 = vst.msk [vmem:[#allocation7] sm:$0x3] %vm92_vm0, %v84_v4  ;;  %v86_v10 = vadd.f32 %v130_v6, %v46_v5  ;;  %v48_v11 = vld [vmem:[#allocation2 + $0x8] sm:$0x3]  ;;  %v87_v12 = vadd.f32 %v131_v9, %v47_v8  ;;  %v132_v13 = vld [vmem:[#allocation5 + $0x4] ss:$0 sm:$0xff] }
  0x11   :  { %94 = vst.msk [vmem:[#allocation7 + $0x2] sm:$0x3] %vm92_vm0, %v85_v7  ;;  %v49_v14 = vld [vmem:[#allocation2 + $0xa] sm:$0x3]  ;;  %v133_v15 = vld [vmem:[#allocation5 + $0x5] ss:$0 sm:$0xff]  ;;  %v88_v16 = vadd.f32 %v132_v13, %v48_v11 }
  0x12   :  { %95 = vst.msk [vmem:[#allocation7 + $0x4] sm:$0x3] %vm92_vm0, %v86_v10  ;;  %v50_v17 = vld [vmem:[#allocation2 + $0xc] sm:$0x3]  ;;  %v89_v18 = vadd.f32 %v133_v15, %v49_v14  ;;  %v134_v19 = vld [vmem:[#allocation5 + $0x6] ss:$0 sm:$0xff] }
  0x13   :  { %96 = vst.msk [vmem:[#allocation7 + $0x6] sm:$0x3] %vm92_vm0, %v87_v12  ;;  %v51_v20 = vld [vmem:[#allocation2 + $0xe] sm:$0x3]  ;;  %v135_v21 = vld [vmem:[#allocation5 + $0x7] ss:$0 sm:$0xff]  ;;  %v90_v22 = vadd.f32 %v134_v19, %v50_v17 }
  0x14   :  { %97 = vst.msk [vmem:[#allocation7 + $0x8] sm:$0x3] %vm92_vm0, %v88_v16  ;;  %v91_v23 = vadd.f32 %v135_v21, %v51_v20 }
  0x15   :  { %98 = vst.msk [vmem:[#allocation7 + $0xa] sm:$0x3] %vm92_vm0, %v89_v18 }
  0x16   :  { %99 = vst.msk [vmem:[#allocation7 + $0xc] sm:$0x3] %vm92_vm0, %v90_v22 }
  0x17   :  { %100 = vst.msk [vmem:[#allocation7 + $0xe] sm:$0x3] %vm92_vm0, %v91_v23 }
  0x18   :  { %113 = dma.vmem_to_hbm [thread:$0]  %s106_s1, 256, %s108_s25, [#allocation4], %s215_s17, %s215_s17, %s216_s18  }
  0x19   :  { %212 = dma.done.wait [#allocation4], 256  }
  0x1a   :  { %213 = vsyncadd [#allocation4], 4294967040 }
  0x1b   :  { %118 = vsyncpa [#allocation3], 1 }
  0x1c   :  { %119 = vsyncpa [#allocation6], 1 }
  0x1d   :  { %120 = vsyncpa [#allocation4], 1 }

</bundles_post_ra>
